<compile_context>
chip_gen: v7x
topology: tpu7x:2x2x1
jax: 0.10.0
libtpu: 0.0.40
codegen_flags: <defaults>
</compile_context>

<pallas_src>
import math
import functools

import jax
import jax.numpy as jnp
from jax import lax
from jax.experimental import pallas as pl
from jax.experimental.pallas import tpu as pltpu

_PAD_LABEL = jnp.iinfo(jnp.int32).min  # sentinel label for padded rows/columns


def _round_up(a, b):
    return ((a + b - 1) // b) * b


def _triplet_kernel(xr_ref, xc_ref, sqr_ref, sqc_ref, labr_ref, labc_ref,
                    out_ref, ap2_ref, an2_ref):
    """One (row-tile i, col-tile j) grid step.

    xr_ref  : (tm, Dp)  feature rows of the row tile
    xc_ref  : (tn, Dp)  feature rows of the column tile
    sqr_ref : (1, tm)   squared norms of the row tile (lane-dense)
    sqc_ref : (tn, 1)   squared norms of the column tile
    labr_ref: (1, tm)   labels of the row tile
    labc_ref: (tn, 1)   labels of the column tile
    out_ref : (2, tm)   row 0 = hardest-positive dist, row 1 = hardest-negative dist
    ap2_ref/an2_ref : (1, tm) running max/min of squared distances (VMEM scratch)
    """
    j = pl.program_id(1)

    @pl.when(j == 0)
    def _init():
        ap2_ref[...] = jnp.full_like(ap2_ref, -jnp.inf)
        an2_ref[...] = jnp.full_like(an2_ref, jnp.inf)

    # Gram tile on the MXU, contracting the feature dim of both operands
    # (no transpose of either tile). Result layout is (cols, rows) so the
    # per-row reduction below is a sublane reduce into a lane-dense (1, tm).
    gram = lax.dot_general(
        xc_ref[...], xr_ref[...],
        dimension_numbers=(((1,), (1,)), ((), ())),
        preferred_element_type=jnp.float32)                        # (tn, tm)
    d2 = sqc_ref[...] + sqr_ref[...] - 2.0 * gram                  # squared distances

    labc = labc_ref[...]                                           # (tn, 1)
    labr = labr_ref[...]                                           # (1, tm)
    is_pos = labc == labr                                          # (tn, tm)
    col_valid = labc != _PAD_LABEL                                 # (tn, 1)
    is_neg = jnp.logical_and(jnp.logical_not(is_pos), col_valid)   # exclude pad cols

    ap2 = jnp.max(jnp.where(is_pos, d2, -jnp.inf), axis=0, keepdims=True)  # (1, tm)
    an2 = jnp.min(jnp.where(is_neg, d2, jnp.inf), axis=0, keepdims=True)   # (1, tm)
    ap2_ref[...] = jnp.maximum(ap2_ref[...], ap2)
    an2_ref[...] = jnp.minimum(an2_ref[...], an2)

    # sqrt only the 2*tm reduced values (clamp before sqrt, like the reference).
    @pl.when(j == pl.num_programs(1) - 1)
    def _finalize():
        out_ref[0:1, :] = jnp.sqrt(jnp.maximum(ap2_ref[...], 1e-12))
        out_ref[1:2, :] = jnp.sqrt(jnp.maximum(an2_ref[...], 1e-12))


@functools.partial(jax.jit, static_argnames=("block_rows", "block_cols"))
def triplet_loss_forward(inputs, labels, *, block_rows=256, block_cols=256):
    """Returns (dist_ap, dist_an), each shape (N,) float32, matching TripletLoss.forward."""
    N, D = inputs.shape
    assert block_rows % 128 == 0 and block_cols % 128 == 0

    # Tile sizes: multiples of 128 so every lane-dense block is aligned.
    # v7x (64 MiB VMEM): keep tm=tn in 256-512; v5e/v6e (128 MiB): up to ~1024.
    n128 = _round_up(N, 128)
    tm = min(block_rows, n128)
    tn = min(block_cols, n128)
    n_pad = _round_up(N, math.lcm(tm, tn))
    d_pad = _round_up(D, 128)  # zero-padding the feature dim keeps distances exact

    x = inputs  # keep the model's dtype (bf16 features -> bf16-rate MXU Gram)
    labels_i32 = labels.astype(jnp.int32).reshape(N)

    # Precompute squared norms once (f32) and labels, in both orientations.
    sq = jnp.sum(x.astype(jnp.float32) ** 2, axis=1)                         # (N,)
    sq_row = jnp.zeros((1, n_pad), jnp.float32).at[0, :N].set(sq)            # (1, Np)
    sq_col = sq_row.reshape(n_pad, 1)                                        # (Np, 1)
    lab_row = jnp.full((1, n_pad), _PAD_LABEL, jnp.int32).at[0, :N].set(labels_i32)
    lab_col = lab_row.reshape(n_pad, 1)
    x_pad = jnp.zeros((n_pad, d_pad), x.dtype).at[:N, :D].set(x)

    grid = (n_pad // tm, n_pad // tn)

    out = pl.pallas_call(
        _triplet_kernel,
        out_shape=jax.ShapeDtypeStruct((2, n_pad), jnp.float32),
        grid_spec=pltpu.PrefetchScalarGridSpec(
            num_scalar_prefetch=0,
            grid=grid,
            in_specs=[
                pl.BlockSpec((tm, d_pad), lambda i, j: (i, 0)),   # feature row tile
                pl.BlockSpec((tn, d_pad), lambda i, j: (j, 0)),   # feature col tile
                pl.BlockSpec((1, tm), lambda i, j: (0, i)),       # sq norms (rows)
                pl.BlockSpec((tn, 1), lambda i, j: (j, 0)),       # sq norms (cols)
                pl.BlockSpec((1, tm), lambda i, j: (0, i)),       # labels (rows)
                pl.BlockSpec((tn, 1), lambda i, j: (j, 0)),       # labels (cols)
            ],
            out_specs=pl.BlockSpec((2, tm), lambda i, j: (0, i)),
            scratch_shapes=[
                pltpu.VMEM((1, tm), jnp.float32),   # running max of squared dist
                pltpu.VMEM((1, tm), jnp.float32),   # running min of squared dist
            ],
        ),
        compiler_params=pltpu.CompilerParams(
            dimension_semantics=("parallel", "arbitrary"),
            vmem_limit_bytes=64 * 1024 * 1024,
        ),
    )(x_pad, x_pad, sq_row, sq_col, lab_row, lab_col)

    return out[0, :N], out[1, :N]


def _reference(inputs, labels):
    """Plain-JAX reference mirroring the PyTorch code."""
    x = inputs.astype(jnp.float32)
    sq = jnp.sum(x * x, axis=1, keepdims=True)
    dist = jnp.sqrt(jnp.maximum(sq + sq.T - 2.0 * (x @ x.T), 1e-12))
    is_pos = labels[:, None] == labels[None, :]
    ap = jnp.max(jnp.where(is_pos, dist, -jnp.inf), axis=1)
    an = jnp.min(jnp.where(is_pos, jnp.inf, dist), axis=1)
    return ap, an


# TODO(synk): the MarginRankingLoss tail in the PyTorch module sits after an early
# `return (dist_ap, dist_an)` and is dead code, so it is intentionally not implemented.

if __name__ == "__main__":
    key = jax.random.PRNGKey(0)
    N, D = 8, 32  # batch_size, feat_dim
    feats = jax.random.normal(key, (N, D), dtype=jnp.float32)
    # 4 identities, 2 samples each (every row has >=1 positive and >=1 negative).
    labels = jnp.array([0, 0, 1, 1, 2, 2, 3, 3], dtype=jnp.int32)

    dist_ap, dist_an = triplet_loss_forward(feats, labels)
    jax.block_until_ready((dist_ap, dist_an))

    ref_ap, ref_an = _reference(feats, labels)
    assert jnp.allclose(dist_ap, ref_ap, atol=1e-4, rtol=1e-4), (dist_ap, ref_ap)
    assert jnp.allclose(dist_an, ref_an, atol=1e-4, rtol=1e-4), (dist_an, ref_an)

    print("KERNEL_OK")
</pallas_src>

<mosaic_0001>
module attributes {stable_mosaic.version = 11 : i64} {
  func.func @_triplet_kernel(%arg0: i32, %arg1: i32, %arg2: memref<128x128xf32, #tpu.memory_space<vmem>>, %arg3: memref<128x128xf32, #tpu.memory_space<vmem>>, %arg4: memref<1x128xf32, #tpu.memory_space<vmem>>, %arg5: memref<128x1xf32, #tpu.memory_space<vmem>>, %arg6: memref<1x128xi32, #tpu.memory_space<vmem>>, %arg7: memref<128x1xi32, #tpu.memory_space<vmem>>, %arg8: memref<2x128xf32, #tpu.memory_space<vmem>>, %arg9: memref<1x128xf32, #tpu.memory_space<vmem>>, %arg10: memref<1x128xf32, #tpu.memory_space<vmem>>) attributes {dimension_semantics = [#tpu.dimension_semantics<parallel>, #tpu.dimension_semantics<arbitrary>], iteration_bounds = array<i64: 1, 1>, scalar_prefetch = 0 : i64, scratch_operands = 2 : i64, tpu.core_type = #tpu.core_type<tc>, window_params = [{transform_indices = @transform_0, window_bounds = array<i64: 128, 128>}, {transform_indices = @transform_1, window_bounds = array<i64: 128, 128>}, {transform_indices = @transform_2, window_bounds = array<i64: 1, 128>}, {transform_indices = @transform_3, window_bounds = array<i64: 128, 1>}, {transform_indices = @transform_4, window_bounds = array<i64: 1, 128>}, {transform_indices = @transform_5, window_bounds = array<i64: 128, 1>}, {transform_indices = @transform_6, window_bounds = array<i64: 2, 128>}]} {
    %c0_i32 = arith.constant 0 : i32
    %0 = arith.cmpi eq, %arg1, %c0_i32 : i32
    %1 = arith.extui %0 : i1 to i32
    %c0_i32_0 = arith.constant 0 : i32
    %2 = arith.cmpi ne, %1, %c0_i32_0 : i32
    scf.if %2 {
      %cst_28 = arith.constant 0xFF800000 : f32
      %41 = vector.broadcast %cst_28 : f32 to vector<1x128xf32>
      %c0_29 = arith.constant 0 : index
      %c0_30 = arith.constant 0 : index
      %42 = vector.load %arg9[%c0_29, %c0_30] : memref<1x128xf32, #tpu.memory_space<vmem>>, vector<1x128xf32>
      tpu.vector_store %arg9[%c0_29, %c0_30], %41 {strides = array<i32>} : memref<1x128xf32, #tpu.memory_space<vmem>>, vector<1x128xf32>,
      %cst_31 = arith.constant 0x7F800000 : f32
      %43 = vector.broadcast %cst_31 : f32 to vector<1x128xf32>
      %c0_32 = arith.constant 0 : index
      %c0_33 = arith.constant 0 : index
      %44 = vector.load %arg10[%c0_32, %c0_33] : memref<1x128xf32, #tpu.memory_space<vmem>>, vector<1x128xf32>
      tpu.vector_store %arg10[%c0_32, %c0_33], %43 {strides = array<i32>} : memref<1x128xf32, #tpu.memory_space<vmem>>, vector<1x128xf32>,
    } else {
    }
    %c0 = arith.constant 0 : index
    %c0_1 = arith.constant 0 : index
    %3 = vector.load %arg3[%c0, %c0_1] : memref<128x128xf32, #tpu.memory_space<vmem>>, vector<128x128xf32>
    %c0_2 = arith.constant 0 : index
    %c0_3 = arith.constant 0 : index
    %4 = vector.load %arg2[%c0_2, %c0_3] : memref<128x128xf32, #tpu.memory_space<vmem>>, vector<128x128xf32>
    %cst = arith.constant dense<0.000000e+00> : vector<128x128xf32>
    %5 = tpu.matmul %3, %4, %cst {dimension_numbers = #tpu.dot_dimension_numbers<[1], [1], [0], [0], [0, 0, 1, 0], [], []>} : vector<128x128xf32>, vector<128x128xf32>, vector<128x128xf32> -> vector<128x128xf32>
    %c0_4 = arith.constant 0 : index
    %c0_5 = arith.constant 0 : index
    %6 = vector.load %arg5[%c0_4, %c0_5] : memref<128x1xf32, #tpu.memory_space<vmem>>, vector<128x1xf32>
    %c0_6 = arith.constant 0 : index
    %c0_7 = arith.constant 0 : index
    %7 = vector.load %arg4[%c0_6, %c0_7] : memref<1x128xf32, #tpu.memory_space<vmem>>, vector<1x128xf32>
    %8 = vector.broadcast %6 : vector<128x1xf32> to vector<128x128xf32>
    %9 = vector.broadcast %7 : vector<1x128xf32> to vector<128x128xf32>
    %10 = arith.addf %8, %9 : vector<128x128xf32>
    %cst_8 = arith.constant 2.000000e+00 : f32
    %11 = vector.broadcast %cst_8 : f32 to vector<128x128xf32>
    %12 = arith.mulf %11, %5 : vector<128x128xf32>
    %13 = arith.subf %10, %12 : vector<128x128xf32>
    %c0_9 = arith.constant 0 : index
    %c0_10 = arith.constant 0 : index
    %14 = vector.load %arg7[%c0_9, %c0_10] : memref<128x1xi32, #tpu.memory_space<vmem>>, vector<128x1xi32>
    %c0_11 = arith.constant 0 : index
    %c0_12 = arith.constant 0 : index
    %15 = vector.load %arg6[%c0_11, %c0_12] : memref<1x128xi32, #tpu.memory_space<vmem>>, vector<1x128xi32>
    %16 = vector.broadcast %14 : vector<128x1xi32> to vector<128x128xi32>
    %17 = vector.broadcast %15 : vector<1x128xi32> to vector<128x128xi32>
    %18 = arith.cmpi eq, %16, %17 : vector<128x128xi32>
    %c-2147483648_i32 = arith.constant -2147483648 : i32
    %19 = vector.broadcast %c-2147483648_i32 : i32 to vector<128x1xi32>
    %20 = arith.cmpi ne, %14, %19 : vector<128x1xi32>
    %cst_13 = arith.constant dense<true> : vector<128x128xi1>
    %21 = arith.xori %18, %cst_13 : vector<128x128xi1>
    %22 = vector.broadcast %20 : vector<128x1xi1> to vector<128x128xi1>
    %23 = arith.andi %21, %22 : vector<128x128xi1>
    %cst_14 = arith.constant 0xFF800000 : f32
    %24 = vector.broadcast %cst_14 : f32 to vector<128x128xf32>
    %25 = arith.select %18, %13, %24 : vector<128x128xi1>, vector<128x128xf32>
    %cst_15 = arith.constant dense<0xFF800000> : vector<128xf32>
    %26 = vector.multi_reduction <maximumf>, %25, %cst_15 [0] : vector<128x128xf32> to vector<128xf32>
    %27 = vector.shape_cast %26 : vector<128xf32> to vector<1x128xf32>
    %cst_16 = arith.constant 0x7F800000 : f32
    %28 = vector.broadcast %cst_16 : f32 to vector<128x128xf32>
    %29 = arith.select %23, %13, %28 : vector<128x128xi1>, vector<128x128xf32>
    %cst_17 = arith.constant dense<0x7F800000> : vector<128xf32>
    %30 = vector.multi_reduction <minimumf>, %29, %cst_17 [0] : vector<128x128xf32> to vector<128xf32>
    %31 = vector.shape_cast %30 : vector<128xf32> to vector<1x128xf32>
    %c0_18 = arith.constant 0 : index
    %c0_19 = arith.constant 0 : index
    %32 = vector.load %arg9[%c0_18, %c0_19] : memref<1x128xf32, #tpu.memory_space<vmem>>, vector<1x128xf32>
    %33 = arith.maximumf %32, %27 : vector<1x128xf32>
    %c0_20 = arith.constant 0 : index
    %c0_21 = arith.constant 0 : index
    %34 = vector.load %arg9[%c0_20, %c0_21] : memref<1x128xf32, #tpu.memory_space<vmem>>, vector<1x128xf32>
    tpu.vector_store %arg9[%c0_20, %c0_21], %33 {strides = array<i32>} : memref<1x128xf32, #tpu.memory_space<vmem>>, vector<1x128xf32>,
    %c0_22 = arith.constant 0 : index
    %c0_23 = arith.constant 0 : index
    %35 = vector.load %arg10[%c0_22, %c0_23] : memref<1x128xf32, #tpu.memory_space<vmem>>, vector<1x128xf32>
    %36 = arith.minimumf %35, %31 : vector<1x128xf32>
    %c0_24 = arith.constant 0 : index
    %c0_25 = arith.constant 0 : index
    %37 = vector.load %arg10[%c0_24, %c0_25] : memref<1x128xf32, #tpu.memory_space<vmem>>, vector<1x128xf32>
    tpu.vector_store %arg10[%c0_24, %c0_25], %36 {strides = array<i32>} : memref<1x128xf32, #tpu.memory_space<vmem>>, vector<1x128xf32>,
    %c0_i32_26 = arith.constant 0 : i32
    %38 = arith.cmpi eq, %arg1, %c0_i32_26 : i32
    %39 = arith.extui %38 : i1 to i32
    %c0_i32_27 = arith.constant 0 : i32
    %40 = arith.cmpi ne, %39, %c0_i32_27 : i32
    scf.if %40 {
      %c0_28 = arith.constant 0 : index
      %c0_29 = arith.constant 0 : index
      %41 = vector.load %arg9[%c0_28, %c0_29] : memref<1x128xf32, #tpu.memory_space<vmem>>, vector<1x128xf32>
      %cst_30 = arith.constant 9.99999996E-13 : f32
      %42 = vector.broadcast %cst_30 : f32 to vector<1x128xf32>
      %43 = arith.maximumf %41, %42 : vector<1x128xf32>
      %44 = math.sqrt %43 : vector<1x128xf32>
      %c0_31 = arith.constant 0 : index
      %c0_32 = arith.constant 0 : index
      %45 = vector.load %arg8[%c0_31, %c0_32] : memref<2x128xf32, #tpu.memory_space<vmem>>, vector<1x128xf32>
      tpu.vector_store %arg8[%c0_31, %c0_32], %44 {strides = array<i32>} : memref<2x128xf32, #tpu.memory_space<vmem>>, vector<1x128xf32>,
      %c0_33 = arith.constant 0 : index
      %c0_34 = arith.constant 0 : index
      %46 = vector.load %arg10[%c0_33, %c0_34] : memref<1x128xf32, #tpu.memory_space<vmem>>, vector<1x128xf32>
      %cst_35 = arith.constant 9.99999996E-13 : f32
      %47 = vector.broadcast %cst_35 : f32 to vector<1x128xf32>
      %48 = arith.maximumf %46, %47 : vector<1x128xf32>
      %49 = math.sqrt %48 : vector<1x128xf32>
      %c1 = arith.constant 1 : index
      %c0_36 = arith.constant 0 : index
      %50 = vector.load %arg8[%c1, %c0_36] : memref<2x128xf32, #tpu.memory_space<vmem>>, vector<1x128xf32>
      tpu.vector_store %arg8[%c1, %c0_36], %49 {strides = array<i32>} : memref<2x128xf32, #tpu.memory_space<vmem>>, vector<1x128xf32>,
    } else {
    }
    return
  }
  func.func @transform_0(%arg0: i32, %arg1: i32) -> (i32, i32) {
    %c0_i32 = arith.constant 0 : i32
    %c0_i32_0 = arith.constant 0 : i32
    return %arg0, %c0_i32 : i32, i32
  }
  func.func @transform_1(%arg0: i32, %arg1: i32) -> (i32, i32) {
    %c0_i32 = arith.constant 0 : i32
    %c0_i32_0 = arith.constant 0 : i32
    return %arg1, %c0_i32 : i32, i32
  }
  func.func @transform_2(%arg0: i32, %arg1: i32) -> (i32, i32) {
    %c0_i32 = arith.constant 0 : i32
    %c0_i32_0 = arith.constant 0 : i32
    return %c0_i32, %arg0 : i32, i32
  }
  func.func @transform_3(%arg0: i32, %arg1: i32) -> (i32, i32) {
    %c0_i32 = arith.constant 0 : i32
    %c0_i32_0 = arith.constant 0 : i32
    return %arg1, %c0_i32 : i32, i32
  }
  func.func @transform_4(%arg0: i32, %arg1: i32) -> (i32, i32) {
    %c0_i32 = arith.constant 0 : i32
    %c0_i32_0 = arith.constant 0 : i32
    return %c0_i32, %arg0 : i32, i32
  }
  func.func @transform_5(%arg0: i32, %arg1: i32) -> (i32, i32) {
    %c0_i32 = arith.constant 0 : i32
    %c0_i32_0 = arith.constant 0 : i32
    return %arg1, %c0_i32 : i32, i32
  }
  func.func @transform_6(%arg0: i32, %arg1: i32) -> (i32, i32) {
    %c0_i32 = arith.constant 0 : i32
    %c0_i32_0 = arith.constant 0 : i32
    return %c0_i32, %arg0 : i32, i32
  }
}

</mosaic_0001>

<bundles_post_ra>
// kernel: triplet_loss_forward.1
= control target key start
LH: loop header
LB: loop body
LE: loop exit
PB: predicated region body
PF: predicated region fallthrough
CT: control target
= control target key end

     0   :  { %11 = vsyncpa [#allocation5], 0  ;;  %s1750_s0 = inlined_call_operand.hbm [shape: f32[128,128], index: 0, kind: input, shape index: {}, may-alias: {0,1}]   ;;  %s1751_s1 = inlined_call_operand.hbm [shape: f32[128,128], index: 1, kind: input, shape index: {}, may-alias: {0,1}]   ;;  %s1752_s2 = inlined_call_operand.hbm [shape: f32[1,128], index: 2, kind: input, shape index: {}]   ;;  %s1753_s3 = inlined_call_operand.hbm [shape: f32[128,1], index: 3, kind: input, shape index: {}]   ;;  %s1754_s4 = inlined_call_operand.hbm [shape: s32[1,128], index: 4, kind: input, shape index: {}]   ;;  %s1755_s5 = inlined_call_operand.hbm [shape: s32[128,1], index: 5, kind: input, shape index: {}]   ;;  %s1756_s6 = inlined_call_operand.hbm [shape: f32[2,128], index: 6, kind: output, shape index: {}]  }
   0x1   :  { %12 = vsyncpa [#allocation8], 0 }
   0x2   :  { %13 = vsyncpa [#allocation11], 0 }
   0x3   :  { %14 = vsyncpa [#allocation14], 0 }
   0x4   :  { %15 = vsyncpa [#allocation6], 0  ;;  %s1091_s21 = smov [#allocation7]   ;;  %s1092_s23 = smov [#allocation10]  }
   0x5   :  { %s33_s22 = sshll.u32 %s1091_s21, 4  ;;  %s55_s24 = sshll.u32 %s1092_s23, 4  ;;  %s34_s22 = int_to_ptr.vmem [resolvable:$true] %s33_s22  ;;  %s1139_s24 = int_to_ptr.vmem [resolvable:$true] %s55_s24 }
   0x6   :  { %s927_s27 = scalar_lea.hbm %s1751_s1, 2048 }
   0x7   :  { %p928_p0 = scmp.ne.s32.totalorder %s1751_s1, %s927_s27  ;;  %p931_p1 = scmp.lt.u32.totalorder %s927_s27, %s1751_s1 }
   0x9   :  { %p933_p2 = pnand %p931_p1, %p928_p0 }
   0xb   :  { %936 = shalt.err (!%p933_p2)
}
   0xc   :  { %s937_s8 = scalar_lea.vmem %s34_s22, 2048  ;;  %p942_p4 = scmp.lt.s32.totalorder %s34_s22, %s34_s22 }
   0xd   :  { %p938_p3 = scmp.ne.s32.totalorder %s34_s22, %s937_s8  ;;  %p943_p5 = scmp.lt.s32.totalorder %s937_s8, %s937_s8 }
   0xf   :  { %p944_p6 = por %p943_p5, %p942_p4 }
  0x11   :  { %p945_p7 = pnand %p944_p6, %p938_p3 }
  0x13   :  { %948 = shalt.err (!%p945_p7)
}
  0x14   :  { %s1093_s9 = smov 128   ;;  %s1094_s10 = smov 8  }
  0x15   :  { %39 = dma.hbm_to_vmem [thread:$0]  %s1751_s1, 2048, %s34_s22, [#allocation8], %s1093_s9, %s1093_s9, %s1094_s10  }
  0x16   :  { %s949_s15 = scalar_lea.hbm %s1753_s3, 2048 }
  0x17   :  { %p950_p8 = scmp.ne.s32.totalorder %s1753_s3, %s949_s15  ;;  %p953_p9 = scmp.lt.u32.totalorder %s949_s15, %s1753_s3 }
  0x19   :  { %p955_p10 = pnand %p953_p9, %p950_p8 }
  0x1b   :  { %958 = shalt.err (!%p955_p10)
}
  0x1c   :  { %s959_s20 = scalar_lea.vmem %s1139_s24, 2048  ;;  %p964_p12 = scmp.lt.s32.totalorder %s1139_s24, %s1139_s24 }
  0x1d   :  { %p960_p11 = scmp.ne.s32.totalorder %s1139_s24, %s959_s20  ;;  %p965_p13 = scmp.lt.s32.totalorder %s959_s20, %s959_s20 }
  0x1f   :  { %p966_p0 = por %p965_p13, %p964_p12 }
  0x21   :  { %p967_p1 = pnand %p966_p0, %p960_p11 }
  0x23   :  { %970 = shalt.err (!%p967_p1)
}
  0x24   :  { %61 = dma.hbm_to_vmem [thread:$0]  %s1753_s3, 2048, %s1139_s24, [#allocation11], %s1093_s9, %s1093_s9, %s1094_s10  }
  0x25   :  { %s1095_s22 = smov [#allocation4]   ;;  %s1096_s25 = smov [#allocation9]  }
  0x26   :  { %s21_s23 = sshll.u32 %s1095_s22, 4  ;;  %s46_s26 = sshll.u32 %s1096_s25, 4  ;;  %s22_s23 = int_to_ptr.vmem [resolvable:$true] %s21_s23  ;;  %s47_s26 = int_to_ptr.vmem [resolvable:$true] %s46_s26 }
  0x27   :  { %s971_s29 = scalar_lea.hbm %s1750_s0, 2048 }
  0x28   :  { %p972_p2 = scmp.ne.s32.totalorder %s1750_s0, %s971_s29  ;;  %p975_p3 = scmp.lt.u32.totalorder %s971_s29, %s1750_s0 }
  0x2a   :  { %p977_p4 = pnand %p975_p3, %p972_p2 }
  0x2c   :  { %980 = shalt.err (!%p977_p4)
}
  0x2d   :  { %s981_s3 = scalar_lea.vmem %s22_s23, 2048  ;;  %p986_p6 = scmp.lt.s32.totalorder %s22_s23, %s22_s23 }
  0x2e   :  { %p982_p5 = scmp.ne.s32.totalorder %s22_s23, %s981_s3  ;;  %p987_p7 = scmp.lt.s32.totalorder %s981_s3, %s981_s3 }
  0x30   :  { %p988_p8 = por %p987_p7, %p986_p6 }
  0x32   :  { %p989_p9 = pnand %p988_p8, %p982_p5 }
  0x34   :  { %992 = shalt.err (!%p989_p9)
}
  0x35   :  { %27 = dma.hbm_to_vmem [thread:$0]  %s1750_s0, 2048, %s22_s23, [#allocation5], %s1093_s9, %s1093_s9, %s1094_s10  }
  0x36   :  { %s993_s15 = scalar_lea.hbm %s1752_s2, 16 }
  0x37   :  { %p994_p10 = scmp.ne.s32.totalorder %s1752_s2, %s993_s15  ;;  %p997_p11 = scmp.lt.u32.totalorder %s993_s15, %s1752_s2 }
  0x39   :  { %p999_p12 = pnand %p997_p11, %p994_p10 }
  0x3b   :  { %1002 = shalt.err (!%p999_p12)
}
  0x3c   :  { %s1003_s20 = scalar_lea.vmem %s47_s26, 16  ;;  %s1007_s1 = scalar_lea.vmem %s47_s26, 32 }
  0x3d   :  { %p1004_p13 = scmp.ne.s32.totalorder %s47_s26, %s1003_s20  ;;  %p1008_p0 = scmp.lt.s32.totalorder %s47_s26, %s47_s26 }
  0x3e   :  { %p1009_p1 = scmp.lt.s32.totalorder %s1007_s1, %s1003_s20 }
  0x40   :  { %p1010_p2 = por %p1009_p1, %p1008_p0 }
  0x42   :  { %p1011_p3 = pnand %p1010_p2, %p1004_p13 }
  0x44   :  { %1014 = shalt.err (!%p1011_p3)
}
  0x45   :  { %49 = dma.hbm_to_vmem [thread:$0]  %s1752_s2, 16, %s47_s26, [#allocation8]  }
  0x46   :  { %s1097_s22 = smov [#allocation12]   ;;  %s1098_s25 = smov [#allocation13]  }
  0x47   :  { %s68_s23 = sshll.u32 %s1097_s22, 4  ;;  %s77_s27 = sshll.u32 %s1098_s25, 4  ;;  %s69_s23 = int_to_ptr.vmem [resolvable:$true] %s68_s23  ;;  %s1203_s27 = int_to_ptr.vmem [resolvable:$true] %s77_s27 }
  0x48   :  { %s1015_s30 = scalar_lea.hbm %s1754_s4, 16 }
  0x49   :  { %p1016_p4 = scmp.ne.s32.totalorder %s1754_s4, %s1015_s30  ;;  %p1019_p5 = scmp.lt.u32.totalorder %s1015_s30, %s1754_s4 }
  0x4b   :  { %p1021_p6 = pnand %p1019_p5, %p1016_p4 }
  0x4d   :  { %1024 = shalt.err (!%p1021_p6)
}
  0x4e   :  { %s1025_s2 = scalar_lea.vmem %s69_s23, 16  ;;  %s1029_s26 = scalar_lea.vmem %s69_s23, 32 }
  0x4f   :  { %p1026_p7 = scmp.ne.s32.totalorder %s69_s23, %s1025_s2  ;;  %p1030_p8 = scmp.lt.s32.totalorder %s69_s23, %s69_s23 }
  0x50   :  { %p1031_p9 = scmp.lt.s32.totalorder %s1029_s26, %s1025_s2 }
  0x52   :  { %p1032_p10 = por %p1031_p9, %p1030_p8 }
  0x54   :  { %p1033_p11 = pnand %p1032_p10, %p1026_p7 }
  0x56   :  { %1036 = shalt.err (!%p1033_p11)
}
  0x57   :  { %71 = dma.hbm_to_vmem [thread:$0]  %s1754_s4, 16, %s69_s23, [#allocation11]  }
  0x58   :  { %s1037_s15 = scalar_lea.hbm %s1755_s5, 2048 }
  0x59   :  { %p1038_p12 = scmp.ne.s32.totalorder %s1755_s5, %s1037_s15  ;;  %p1041_p13 = scmp.lt.u32.totalorder %s1037_s15, %s1755_s5 }
  0x5b   :  { %p1043_p0 = pnand %p1041_p13, %p1038_p12 }
  0x5d   :  { %1046 = shalt.err (!%p1043_p0)
}
  0x5e   :  { %s1047_s20 = scalar_lea.vmem %s1203_s27, 2048  ;;  %p1052_p2 = scmp.lt.s32.totalorder %s1203_s27, %s1203_s27 }
  0x5f   :  { %p1048_p1 = scmp.ne.s32.totalorder %s1203_s27, %s1047_s20  ;;  %p1053_p3 = scmp.lt.s32.totalorder %s1047_s20, %s1047_s20 }
  0x61   :  { %p1054_p4 = por %p1053_p3, %p1052_p2 }
  0x63   :  { %p1055_p5 = pnand %p1054_p4, %p1048_p1 }
  0x65   :  { %1058 = shalt.err (!%p1055_p5)
}
  0x66   :  { %83 = dma.hbm_to_vmem [thread:$0]  %s1755_s5, 2048, %s1203_s27, [#allocation14], %s1093_s9, %s1093_s9, %s1094_s10  }
  0x67   :  { %1081 = dma.done.wait [#allocation5], 2048  }
  0x68   :  { %1082 = vsyncadd [#allocation5], 4294965248 }
  0x69   :  { %1083 = dma.done.wait [#allocation8], 2064  }
  0x6a   :  { %1084 = vsyncadd [#allocation8], 4294965232 }
  0x6b   :  { %1085 = dma.done.wait [#allocation11], 2064  }
  0x6c   :  { %1086 = vsyncadd [#allocation11], 4294965232 }
  0x6d   :  { %1087 = dma.done.wait [#allocation14], 2048  }
  0x6e   :  { %1088 = vsyncadd [#allocation14], 4294965248  ;;  %v1099_v0 = vmov 0   ;;  %v287_v1 = vld [vmem:[#allocation10 + $0x10] sm:$0xff]  ;;  %v285_v2 = vld [vmem:[#allocation10] sm:$0xff]  ;;  %s1103_s5 = smov [#allocation15]  }
  0x6f   :  { %922 = vset.pattern.permute.xlu1 %v1099_v0  ;;  %921 = vset.pattern.permute.xlu0 %v1099_v0  ;;  %v124_v3 = vld [vmem:[#allocation4] sm:$0xff]  ;;  %v125_v4 = vld [vmem:[#allocation4 + $0x8] sm:$0xff]  ;;  %v126_v6 = vld [vmem:[#allocation4 + $0x10] sm:$0xff]  ;;  %s758_s9 = sshll.u32 %s1103_s5, 4  ;;  %s759_s9 = int_to_ptr.vmem [resolvable:$true] %s758_s9 }
  0x70   :  { %314 = vperm.xlu1 %922, %v287_v1   ;;  %304 = vperm.xlu0 %921, %v285_v2   ;;  %v860_v5 = vpack.c.bf16 %v125_v4, %v124_v3  ;;  %v288_v7 = vld [vmem:[#allocation10 + $0x18] sm:$0xff]  ;;  %v286_v8 = vld [vmem:[#allocation10 + $0x8] sm:$0xff]  ;;  %v289_v12 = vld [vmem:[#allocation10 + $0x20] sm:$0xff]  ;;  %s1059_s10 = scalar_lea.vmem %s759_s9, 32  ;;  %p1064_p7 = scmp.lt.s32.totalorder %s759_s9, %s759_s9 }
  0x71   :  { %v127_v9 = vld [vmem:[#allocation4 + $0x18] sm:$0xff]  ;;  %v290_v11 = vld [vmem:[#allocation10 + $0x28] sm:$0xff]  ;;  %v128_v13 = vld [vmem:[#allocation4 + $0x20] sm:$0xff]  ;;  %p1060_p6 = scmp.ne.s32.totalorder %s759_s9, %s1059_s10  ;;  %p1065_p8 = scmp.lt.s32.totalorder %s1059_s10, %s1059_s10 }
  0x72   :  { %861 = vmatprep.subr.bf16.mxu0 %v860_v5  ;;  %892 = vmatprep.subr.bf16.mxu1 %v860_v5  ;;  %v864_v10 = vpack.c.bf16 %v127_v9, %v126_v6  ;;  %v129_v14 = vld [vmem:[#allocation4 + $0x28] sm:$0xff]  ;;  %v292_v15 = vld [vmem:[#allocation10 + $0x38] sm:$0xff]  ;;  %v291_v16 = vld [vmem:[#allocation10 + $0x30] sm:$0xff] }
  0x73   :  { %863 = vmatpush3.bf16.xpose.msra.mxu0 %v860_v5  ;;  %900 = vmatpush3.bf16.xpose.msra.mxu1 %v860_v5  ;;  %v868_v17 = vpack.c.bf16 %v129_v14, %v128_v13  ;;  %v108_v18 = vld [vmem:[#allocation7] sm:$0xff]  ;;  %v294_v20 = vld [vmem:[#allocation10 + $0x48] sm:$0xff]  ;;  %v131_v23 = vld [vmem:[#allocation4 + $0x38] sm:$0xff]  ;;  %p1066_p9 = por %p1065_p8, %p1064_p7 }
  0x74   :  { %319 = vperm.xlu1 %922, %v288_v7   ;;  %309 = vperm.xlu0 %921, %v286_v8   ;;  %v116_v19 = vld [vmem:[#allocation7 + $0x40] sm:$0xff]  ;;  %v130_v22 = vld [vmem:[#allocation4 + $0x30] sm:$0xff]  ;;  %v133_v30 = vld [vmem:[#allocation4 + $0x48] sm:$0xff] }
  0x75   :  { %865 = vmatprep.subr.bf16.mxu0 %v864_v10  ;;  %893 = vmatprep.subr.bf16.mxu1 %v864_v10  ;;  %v293_v21 = vld [vmem:[#allocation10 + $0x40] sm:$0xff]  ;;  %v296_v24 = vld [vmem:[#allocation10 + $0x58] sm:$0xff]  ;;  %v295_v25 = vld [vmem:[#allocation10 + $0x50] sm:$0xff]  ;;  %v872_v26 = vpack.c.bf16 %v131_v23, %v130_v22  ;;  %p1067_p10 = pnand %p1066_p9, %p1060_p6 }
  0x76   :  { %836 = vmatprep.mubr.f32.mxu0 %v108_v18  ;;  %848 = vmatprep.mubr.f32.mxu1 %v116_v19  ;;  %v298_v27 = vld [vmem:[#allocation10 + $0x68] sm:$0xff]  ;;  %v297_v28 = vld [vmem:[#allocation10 + $0x60] sm:$0xff]  ;;  %v300_v31 = vld [vmem:[#allocation10 + $0x78] sm:$0xff] }
  0x77   :  { %v132_v29 = vld [vmem:[#allocation4 + $0x40] sm:$0xff]  ;;  %v299_v32 = vld [vmem:[#allocation10 + $0x70] sm:$0xff]  ;;  %v137_v44 = vld [vmem:[#allocation4 + $0x68] sm:$0xff] }
  0x78   :  { %329 = vperm.xlu1 %922, %v290_v11   ;;  %324 = vperm.xlu0 %921, %v289_v12   ;;  %v876_v33 = vpack.c.bf16 %v133_v30, %v132_v29  ;;  %v437_v34 = vld [vmem:[#allocation13 + $0x8] sm:$0xff]  ;;  %v436_v35 = vld [vmem:[#allocation13] sm:$0xff]  ;;  %v135_v37 = vld [vmem:[#allocation4 + $0x58] sm:$0xff] }
  0x79   :  { %v134_v36 = vld [vmem:[#allocation4 + $0x50] sm:$0xff]  ;;  %v439_v38 = vld [vmem:[#allocation13 + $0x18] sm:$0xff]  ;;  %v440_v42 = vld [vmem:[#allocation13 + $0x20] sm:$0xff]  ;;  %vm522_vm0 = vcmp.ne.s32.totalorder %v437_v34, 2147483648  ;;  %vm521_vm1 = vcmp.ne.s32.totalorder %v436_v35, 2147483648 }
  0x7a   :  { %v438_v39 = vld [vmem:[#allocation13 + $0x10] sm:$0xff]  ;;  %v880_v40 = vpack.c.bf16 %v135_v37, %v134_v36  ;;  %v441_v41 = vld [vmem:[#allocation13 + $0x28] sm:$0xff]  ;;  %v136_v43 = vld [vmem:[#allocation4 + $0x60] sm:$0xff]  ;;  %v554_v48 = vsel %vm522_vm0, 1, %v1099_v0  ;;  %v553_v49 = vsel %vm521_vm1, 1, %v1099_v0  ;;  %vm524_vm2 = vcmp.ne.s32.totalorder %v439_v38, 2147483648 }
  0x7b   :  { %867 = vmatpush3.bf16.xpose.msra.mxu0 %v864_v10  ;;  %901 = vmatpush3.bf16.xpose.msra.mxu1 %v864_v10  ;;  %v443_v45 = vld [vmem:[#allocation13 + $0x38] sm:$0xff]  ;;  %v442_v46 = vld [vmem:[#allocation13 + $0x30] sm:$0xff]  ;;  %v884_v47 = vpack.c.bf16 %v137_v44, %v136_v43  ;;  %vm523_vm3 = vcmp.ne.s32.totalorder %v438_v39, 2147483648  ;;  %v556_v52 = vsel %vm524_vm2, 1, %v1099_v0  ;;  %vm526_vm4 = vcmp.ne.s32.totalorder %v441_v41, 2147483648  ;;  %v445_v59 = vld [vmem:[#allocation13 + $0x48] sm:$0xff] }
  0x7c   :  { %339 = vperm.xlu1 %922, %v292_v15   ;;  %334 = vperm.xlu0 %921, %v291_v16   ;;  %v138_v50 = vld [vmem:[#allocation4 + $0x70] sm:$0xff]  ;;  %v139_v51 = vld [vmem:[#allocation4 + $0x78] sm:$0xff]  ;;  %v555_v53 = vsel %vm523_vm3, 1, %v1099_v0  ;;  %vm525_vm5 = vcmp.ne.s32.totalorder %v440_v42, 2147483648  ;;  %v558_v55 = vsel %vm526_vm4, 1, %v1099_v0  ;;  %vm528_vm6 = vcmp.ne.s32.totalorder %v443_v45, 2147483648 }
  0x7d   :  { %869 = vmatprep.subr.bf16.mxu0 %v868_v17  ;;  %894 = vmatprep.subr.bf16.mxu1 %v868_v17  ;;  %v888_v54 = vpack.c.bf16 %v139_v51, %v138_v50  ;;  %v557_v56 = vsel %vm525_vm5, 1, %v1099_v0  ;;  %vm527_vm7 = vcmp.ne.s32.totalorder %v442_v46, 2147483648  ;;  %v560_v57 = vsel %vm528_vm6, 1, %v1099_v0  ;;  %v444_v60 = vld [vmem:[#allocation13 + $0x40] sm:$0xff]  ;;  %v110_v63 = vld [vmem:[#allocation7 + $0x10] sm:$0xff]  ;;  %v447_v2 = vld [vmem:[#allocation13 + $0x58] sm:$0xff] }
  0x7e   :  { %v559_v58 = vsel %vm527_vm7, 1, %v1099_v0  ;;  %v109_v61 = vld [vmem:[#allocation7 + $0x8] sm:$0xff]  ;;  %v118_v1 = vld [vmem:[#allocation7 + $0x50] sm:$0xff]  ;;  %vm530_vm8 = vcmp.ne.s32.totalorder %v445_v59, 2147483648  ;;  %vm529_vm9 = vcmp.ne.s32.totalorder %v444_v60, 2147483648  ;;  %v111_v4 = vld [vmem:[#allocation7 + $0x18] sm:$0xff] }
  0x7f   :  { %v117_v62 = vld [vmem:[#allocation7 + $0x48] sm:$0xff]  ;;  %v446_v3 = vld [vmem:[#allocation13 + $0x50] sm:$0xff]  ;;  %v112_v6 = vld [vmem:[#allocation7 + $0x20] sm:$0xff]  ;;  %v562_v8 = vsel %vm530_vm8, 1, %v1099_v0  ;;  %v561_v9 = vsel %vm529_vm9, 1, %v1099_v0  ;;  %vm532_vm10 = vcmp.ne.s32.totalorder %v447_v2, 2147483648 }
  0x80   :  { %349 = vperm.xlu1 %922, %v294_v20   ;;  %344 = vperm.xlu0 %921, %v293_v21   ;;  %v119_v5 = vld [vmem:[#allocation7 + $0x58] sm:$0xff]  ;;  %v120_v7 = vld [vmem:[#allocation7 + $0x60] sm:$0xff]  ;;  %vm531_vm11 = vcmp.ne.s32.totalorder %v446_v3, 2147483648  ;;  %v113_v10 = vld [vmem:[#allocation7 + $0x28] sm:$0xff]  ;;  %v564_v14 = vsel %vm532_vm10, 1, %v1099_v0  ;;  %v1100_v37 = vmov -inf  }
  0x81   :  { %v121_v11 = vld [vmem:[#allocation7 + $0x68] sm:$0xff]  ;;  %v114_v12 = vld [vmem:[#allocation7 + $0x30] sm:$0xff]  ;;  %v563_v15 = vsel %vm531_vm11, 1, %v1099_v0  ;;  %v115_v16 = vld [vmem:[#allocation7 + $0x38] sm:$0xff]  ;;  %106 = vst [vmem:[#allocation2] sm:$0x1] %v1100_v37 }
  0x82   :  { %v122_v13 = vld [vmem:[#allocation7 + $0x70] sm:$0xff]  ;;  %v448_v19 = vld [vmem:[#allocation13 + $0x60] sm:$0xff]  ;;  %v451_v20 = vld [vmem:[#allocation13 + $0x78] sm:$0xff]  ;;  %vm1102_vm3 = vmmov 1  }
  0x83   :  { %871 = vmatpush3.bf16.xpose.msra.mxu0 %v868_v17  ;;  %902 = vmatpush3.bf16.xpose.msra.mxu1 %v868_v17  ;;  %v123_v17 = vld [vmem:[#allocation7 + $0x78] sm:$0xff]  ;;  %v449_v18 = vld [vmem:[#allocation13 + $0x68] sm:$0xff]  ;;  %vm533_vm13 = vcmp.ne.s32.totalorder %v448_v19, 2147483648  ;;  %vm536_vm14 = vcmp.ne.s32.totalorder %v451_v20, 2147483648 }
  0x84   :  { %359 = vperm.xlu1 %922, %v296_v24   ;;  %354 = vperm.xlu0 %921, %v295_v25   ;;  %v450_v21 = vld [vmem:[#allocation13 + $0x70] sm:$0xff]  ;;  %vm534_vm12 = vcmp.ne.s32.totalorder %v449_v18, 2147483648  ;;  %v565_v23 = vsel %vm533_vm13, 1, %v1099_v0  ;;  %v568_v24 = vsel %vm536_vm14, 1, %v1099_v0 }
  0x85   :  { %873 = vmatprep.subr.bf16.mxu0 %v872_v26  ;;  %895 = vmatprep.subr.bf16.mxu1 %v872_v26  ;;  %v566_v22 = vsel %vm534_vm12, 1, %v1099_v0  ;;  %vm535_vm15 = vcmp.ne.s32.totalorder %v450_v21, 2147483648 }
  0x86   :  { %v567_v25 = vsel %vm535_vm15, 1, %v1099_v0 }
  0x88   :  { %369 = vperm.xlu1 %922, %v298_v27   ;;  %364 = vperm.xlu0 %921, %v297_v28  }
  0x8b   :  { %875 = vmatpush3.bf16.xpose.msra.mxu0 %v872_v26  ;;  %903 = vmatpush3.bf16.xpose.msra.mxu1 %v872_v26 }
  0x8c   :  { %379 = vperm.xlu1 %922, %v300_v31   ;;  %374 = vperm.xlu0 %921, %v299_v32  }
  0x8d   :  { %877 = vmatprep.subr.bf16.mxu0 %v876_v33  ;;  %896 = vmatprep.subr.bf16.mxu1 %v876_v33 }
  0x90   :  { %457 = vperm.xlu1 %922, %v437_v34   ;;  %454 = vperm.xlu0 %921, %v436_v35  }
  0x93   :  { %879 = vmatpush3.bf16.xpose.msra.mxu0 %v876_v33  ;;  %904 = vmatpush3.bf16.xpose.msra.mxu1 %v876_v33 }
  0x94   :  { %463 = vperm.xlu1 %922, %v439_v38   ;;  %460 = vperm.xlu0 %921, %v438_v39   ;;  %v1101_v38 = vmov inf  }
  0x95   :  { %881 = vmatprep.subr.bf16.mxu0 %v880_v40  ;;  %897 = vmatprep.subr.bf16.mxu1 %v880_v40  ;;  %107 = vst [vmem:[#allocation3] sm:$0x1] %v1101_v38 }
  0x98   :  { %469 = vperm.xlu1 %922, %v441_v41   ;;  %466 = vperm.xlu0 %921, %v440_v42  }
  0x9b   :  { %883 = vmatpush3.bf16.xpose.msra.mxu0 %v880_v40  ;;  %905 = vmatpush3.bf16.xpose.msra.mxu1 %v880_v40 }
  0x9c   :  { %475 = vperm.xlu1 %922, %v443_v45   ;;  %472 = vperm.xlu0 %921, %v442_v46  }
  0x9d   :  { %885 = vmatprep.subr.bf16.mxu0 %v884_v47  ;;  %898 = vmatprep.subr.bf16.mxu1 %v884_v47 }
  0xa0   :  { %573 = vperm.xlu1 %922, %v554_v48   ;;  %570 = vperm.xlu0 %921, %v553_v49  }
  0xa3   :  { %887 = vmatpush3.bf16.xpose.msra.mxu0 %v884_v47  ;;  %906 = vmatpush3.bf16.xpose.msra.mxu1 %v884_v47 }
  0xa4   :  { %579 = vperm.xlu1 %922, %v556_v52   ;;  %576 = vperm.xlu0 %921, %v555_v53  }
  0xa5   :  { %889 = vmatprep.subr.bf16.mxu0 %v888_v54  ;;  %899 = vmatprep.subr.bf16.mxu1 %v888_v54 }
  0xa8   :  { %585 = vperm.xlu1 %922, %v558_v55   ;;  %582 = vperm.xlu0 %921, %v557_v56  }
  0xab   :  { %891 = vmatpush3.bf16.xpose.msra.mxu0 %v888_v54  ;;  %907 = vmatpush3.bf16.xpose.msra.mxu1 %v888_v54 }
  0xac   :  { %591 = vperm.xlu1 %922, %v560_v57   ;;  %588 = vperm.xlu0 %921, %v559_v58  }
  0xb0   :  { %481 = vperm.xlu1 %922, %v445_v59   ;;  %478 = vperm.xlu0 %921, %v444_v60  }
  0xb2   :  { %837 = vmatmul.mubr.f32.vlgmr.msra.gmra.mrb[0].mxu0 %v109_v61  ;;  %849 = vmatmul.mubr.f32.vlgmr.msra.gmra.mrb[0].mxu1 %v117_v62 }
  0xb3   :  { %839 = vmatprep.mubr.f32.mxu0 %v110_v63  ;;  %851 = vmatprep.mubr.f32.mxu1 %v118_v1 }
  0xb4   :  { %487 = vperm.xlu1 %922, %v447_v2   ;;  %484 = vperm.xlu0 %921, %v446_v3  }
  0xb6   :  { %840 = vmatmul.mubr.f32.gmra.mrb[2].mxu0 %v111_v4  ;;  %852 = vmatmul.mubr.f32.gmra.mrb[2].mxu1 %v119_v5 }
  0xb7   :  { %842 = vmatprep.mubr.f32.mxu0 %v112_v6  ;;  %854 = vmatprep.mubr.f32.mxu1 %v120_v7  ;;  %v770_v6 = vld [vmem:[#allocation9] ss:$0 sm:$0xff]  ;;  %v1307_v7 = vld [vmem:[#allocation12] ss:$0 sm:$0xff] }
  0xb8   :  { %597 = vperm.xlu1 %922, %v562_v8   ;;  %594 = vperm.xlu0 %921, %v561_v9  }
  0xba   :  { %843 = vmatmul.mubr.f32.gmra.mrb[4].mxu0 %v113_v10  ;;  %855 = vmatmul.mubr.f32.gmra.mrb[4].mxu1 %v121_v11 }
  0xbb   :  { %845 = vmatprep.mubr.f32.mxu0 %v114_v12  ;;  %857 = vmatprep.mubr.f32.mxu1 %v122_v13 }
  0xbc   :  { %603 = vperm.xlu1 %922, %v564_v14   ;;  %600 = vperm.xlu0 %921, %v563_v15  }
  0xbe   :  { %846 = vmatmul.mubr.f32.gmra.mrb[6].mxu0 %v115_v16  ;;  %858 = vmatmul.mubr.f32.gmra.mrb[6].mxu1 %v123_v17 }
  0xc0   :  { %493 = vperm.xlu1 %922, %v449_v18   ;;  %490 = vperm.xlu0 %921, %v448_v19  }
  0xc4   :  { %499 = vperm.xlu1 %922, %v451_v20   ;;  %496 = vperm.xlu0 %921, %v450_v21  }
  0xc8   :  { %609 = vperm.xlu1 %922, %v566_v22   ;;  %606 = vperm.xlu0 %921, %v565_v23  }
  0xcc   :  { %615 = vperm.xlu1 %922, %v568_v24   ;;  %612 = vperm.xlu0 %921, %v567_v25  }
  0xef   :  { %v315_v26 = vpop.permute.xlu1 %314  ;;  %v305_v27 = vpop.permute.xlu0 %304 }
  0xf0   :  { %v1311_v9 = vadd.f32 %v770_v6, %v315_v26  ;;  %v388_v10 = vadd.f32 %v770_v6, %v305_v27 }
  0xf3   :  { %v320_v28 = vpop.permute.xlu1 %319  ;;  %v310_v29 = vpop.permute.xlu0 %309 }
  0xf4   :  { %v1315_v11 = vadd.f32 %v770_v6, %v320_v28  ;;  %v389_v12 = vadd.f32 %v770_v6, %v310_v29 }
  0xf7   :  { %v330_v30 = vpop.permute.xlu1 %329  ;;  %v325_v31 = vpop.permute.xlu0 %324 }
  0xf8   :  { %v1317_v13 = vadd.f32 %v770_v6, %v330_v30  ;;  %v1321_v14 = vadd.f32 %v770_v6, %v325_v31 }
  0xfb   :  { %v340_v32 = vpop.permute.xlu1 %339  ;;  %v335_v33 = vpop.permute.xlu0 %334 }
  0xfc   :  { %v1323_v15 = vadd.f32 %v770_v6, %v340_v32  ;;  %v1325_v16 = vadd.f32 %v770_v6, %v335_v33 }
  0xff   :  { %v350_v34 = vpop.permute.xlu1 %349  ;;  %v345_v35 = vpop.permute.xlu0 %344 }
 0x100   :  { %v397_v18 = vadd.f32 %v770_v6, %v350_v34  ;;  %v396_v19 = vadd.f32 %v770_v6, %v345_v35 }
 0x103   :  { %v360_v36 = vpop.permute.xlu1 %359  ;;  %v355_v39 = vpop.permute.xlu0 %354 }
 0x104   :  { %v1331_v20 = vadd.f32 %v770_v6, %v360_v36  ;;  %v1343_v22 = vadd.f32 %v770_v6, %v355_v39 }
 0x107   :  { %v370_v40 = vpop.permute.xlu1 %369  ;;  %v365_v0 = vpop.permute.xlu0 %364 }
 0x108   :  { %v1345_v23 = vadd.f32 %v770_v6, %v370_v40  ;;  %v1347_v24 = vadd.f32 %v770_v6, %v365_v0 }
 0x10b   :  { %v380_v41 = vpop.permute.xlu1 %379  ;;  %v375_v42 = vpop.permute.xlu0 %374 }
 0x10c   :  { %v1361_v27 = vadd.f32 %v770_v6, %v380_v41  ;;  %v1363_v28 = vadd.f32 %v770_v6, %v375_v42 }
 0x10e   :  { %1771 = vst [vmem:[#allocation22_spill] sm:$0xff] %v1363_v28 }
 0x10f   :  { %v1255_v43 = vpop.permute.xlu1 %457  ;;  %v1257_v44 = vpop.permute.xlu0 %454 }
 0x110   :  { %vm1762_vm0 = vcmp.eq.s32.totalorder %v1255_v43, %v1307_v7  ;;  %vm1760_vm1 = vcmp.eq.s32.totalorder %v1257_v44, %v1307_v7 }
 0x111   :  { %vm1337_vm4 = vmxor %vm1762_vm0, %vm1102_vm3 }
 0x112   :  { %vm1353_vm6 = vmxor %vm1760_vm1, %vm1102_vm3 }
 0x113   :  { %v1259_v45 = vpop.permute.xlu1 %463  ;;  %v1261_v46 = vpop.permute.xlu0 %460 }
 0x114   :  { %vm1758_vm2 = vcmp.eq.s32.totalorder %v1259_v45, %v1307_v7  ;;  %vm1765_vm9 = vcmp.eq.s32.totalorder %v1261_v46, %v1307_v7 }
 0x115   :  { %vm1369_vm8 = vmxor %vm1758_vm2, %vm1102_vm3 }
 0x116   :  { %vm1461_vm0 = vmxor %vm1765_vm9, %vm1102_vm3 }
 0x117   :  { %v1263_v47 = vpop.permute.xlu1 %469  ;;  %v1265_v48 = vpop.permute.xlu0 %466 }
 0x118   :  { %vm1757_vm5 = vcmp.eq.s32.totalorder %v1263_v47, %v1307_v7  ;;  %vm1759_vm7 = vcmp.eq.s32.totalorder %v1265_v48, %v1307_v7 }
 0x119   :  { %vm1380_vm11 = vmxor %vm1757_vm5, %vm1102_vm3 }
 0x11a   :  { %vm1392_vm14 = vmxor %vm1759_vm7, %vm1102_vm3 }
 0x11b   :  { %v1267_v49 = vpop.permute.xlu1 %475  ;;  %v1269_v50 = vpop.permute.xlu0 %472 }
 0x11c   :  { %1766 = vst [vmem:[#allocation21_spill] sm:$0xff] %v1269_v50  ;;  %vm1791_vm12 = vcmp.eq.s32.totalorder %v1267_v49, %v1307_v7 }
 0x11d   :  { %vm1480_vm7 = vmxor %vm1791_vm12, %vm1102_vm3 }
 0x11f   :  { %v1271_v51 = vpop.permute.xlu1 %573  ;;  %v1273_v52 = vpop.permute.xlu0 %570 }
 0x120   :  { %vm618_vm10 = vcmp.eq.s32.totalorder %v1271_v51, 1  ;;  %vm617_vm5 = vcmp.eq.s32.totalorder %v1273_v52, 1 }
 0x121   :  { %vm1403_vm2 = vmand %vm1337_vm4, %vm618_vm10 }
 0x122   :  { %vm1434_vm15 = vmand %vm1353_vm6, %vm617_vm5  ;;  %vm1797_vm6 = vcmp.eq.s32.totalorder %v1255_v43, %v1307_v7 }
 0x123   :  { %v1275_v53 = vpop.permute.xlu1 %579  ;;  %v1277_v54 = vpop.permute.xlu0 %576 }
 0x127   :  { %v1279_v55 = vpop.permute.xlu1 %585  ;;  %v1281_v56 = vpop.permute.xlu0 %582 }
 0x12b   :  { %v1283_v57 = vpop.permute.xlu1 %591  ;;  %v1285_v58 = vpop.permute.xlu0 %588 }
 0x12f   :  { %v1287_v59 = vpop.permute.xlu1 %481  ;;  %v1289_v60 = vpop.permute.xlu0 %478 }
 0x130   :  { %vm1761_vm13 = vcmp.eq.s32.totalorder %v1287_v59, %v1307_v7  ;;  %vm1763_vm1 = vcmp.eq.s32.totalorder %v1289_v60, %v1307_v7  ;;  %vm1798_vm12 = vcmp.eq.s32.totalorder %v1287_v59, %v1307_v7 }
 0x131   :  { %vm1421_vm4 = vmxor %vm1761_vm13, %vm1102_vm3 }
 0x132   :  { %vm1447_vm10 = vmxor %vm1763_vm1, %vm1102_vm3 }
 0x133   :  { %v1291_v61 = vpop.permute.xlu1 %487  ;;  %v1293_v62 = vpop.permute.xlu0 %484 }
 0x137   :  { %v1295_v63 = vpop.permute.xlu1 %597  ;;  %v1297_v1 = vpop.permute.xlu0 %594 }
 0x138   :  { %vm1788_vm13 = vcmp.eq.s32.totalorder %v1295_v63, 1 }
 0x139   :  { %vm1470_vm5 = vmand %vm1421_vm4, %vm1788_vm13  ;;  %vm1794_vm13 = vcmp.eq.s32.totalorder %v1291_v61, %v1307_v7 }
 0x13a   :  { %vm1489_vm4 = vmxor %vm1794_vm13, %vm1102_vm3 }
 0x13b   :  { %v1299_v2 = vpop.permute.xlu1 %603  ;;  %v1301_v3 = vpop.permute.xlu0 %600 }
 0x13c   :  { %vm1808_vm1 = vcmp.eq.s32.totalorder %v1299_v2, 1 }
 0x13d   :  { %vm1554_vm9 = vmand %vm1489_vm4, %vm1808_vm1  ;;  %vm1812_vm1 = vcmp.eq.s32.totalorder %v1289_v60, %v1307_v7  ;;  %vm1813_vm4 = vcmp.eq.s32.totalorder %v1279_v55, 1 }
 0x13f   :  { %v1303_v4 = vpop.permute.xlu1 %493  ;;  %v1305_v5 = vpop.permute.xlu0 %490 }
 0x143   :  { %v1309_v8 = vpop.permute.xlu1 %499  ;;  %v1329_v17 = vpop.permute.xlu0 %496 }
 0x147   :  { %v1359_v26 = vpop.permute.xlu1 %609  ;;  %v1410_v0 = vpop.permute.xlu0 %606 }
 0x185   :  { %v838_v30 = vpop.f32.mrb[0].mxu0  ;;  %v850_v31 = vpop.f32.mrb[0].mxu1 }
 0x186   :  { %v405_v33 = vmul.f32 2.0, %v838_v30  ;;  %v413_v34 = vmul.f32 2.0, %v850_v31  ;;  %v206_v35 = vpop.f32.mrb[1].mxu0  ;;  %v246_v36 = vpop.f32.mrb[1].mxu1 }
 0x187   :  { %v404_v38 = vmul.f32 2.0, %v206_v35  ;;  %v412_v39 = vmul.f32 2.0, %v246_v36 }
 0x188   :  { %v1412_v41 = vsub.f32 %v389_v12, %v405_v33  ;;  %v1414_v42 = vsub.f32 %v397_v18, %v413_v34  ;;  %v1474_v33 = vpop.permute.xlu1 %615 }
 0x189   :  { %v1426_v6 = vsub.f32 %v388_v10, %v404_v38  ;;  %v1428_v21 = vsub.f32 %v396_v19, %v412_v39  ;;  %v841_v12 = vpop.f32.mrb[2].mxu0  ;;  %v853_v30 = vpop.f32.mrb[2].mxu1 }
 0x18a   :  { %v216_v10 = vpop.f32.mrb[3].mxu0  ;;  %v256_v19 = vpop.f32.mrb[3].mxu1  ;;  %v407_v34 = vmul.f32 2.0, %v841_v12  ;;  %v415_v35 = vmul.f32 2.0, %v853_v30  ;;  %v1497_v51 = vsel %vm1797_vm6, %v1412_v41, -inf  ;;  %v687_v12 = vsel %vm1403_vm2, %v1412_v41, inf }
 0x18b   :  { %v406_v36 = vmul.f32 2.0, %v216_v10  ;;  %v414_v38 = vmul.f32 2.0, %v256_v19  ;;  %v1506_v30 = vsel %vm1798_vm12, %v1414_v42, -inf  ;;  %vm1799_vm6 = vcmp.eq.s32.totalorder %v1269_v50, %v1307_v7 }
 0x18c   :  { %vm1515_vm13 = vmxor %vm1799_vm6, %vm1102_vm3  ;;  %vm1802_vm2 = vcmp.eq.s32.totalorder %v1275_v53, 1  ;;  %v1529_v40 = vsub.f32 %v1315_v11, %v407_v34  ;;  %v1532_v41 = vsub.f32 %v1331_v20, %v415_v35  ;;  %vm1805_vm6 = vcmp.eq.s32.totalorder %v1297_v1, 1  ;;  %v1560_v1 = vpop.permute.xlu0 %612 }
 0x18d   :  { %v844_v19 = vpop.f32.mrb[4].mxu0  ;;  %v856_v28 = vpop.f32.mrb[4].mxu1  ;;  %vm1523_vm12 = vmand %vm1369_vm8, %vm1802_vm2  ;;  %v1535_v10 = vsub.f32 %v1311_v9, %v406_v36  ;;  %v1538_v50 = vsub.f32 %v1343_v22, %v414_v38  ;;  %vm520_vm8 = vcmp.eq.s32.totalorder %v1309_v8, %v1307_v7  ;;  %v686_v2 = vsel %vm1434_vm15, %v1426_v6, inf }
 0x18e   :  { %v226_v53 = vpop.f32.mrb[5].mxu0  ;;  %v266_v29 = vpop.f32.mrb[5].mxu1  ;;  %vm1546_vm2 = vmand %vm1447_vm10, %vm1805_vm6  ;;  %v409_v20 = vmul.f32 2.0, %v844_v19  ;;  %v417_v34 = vmul.f32 2.0, %v856_v28  ;;  %vm1811_vm10 = vcmp.eq.s32.totalorder %v1257_v44, %v1307_v7  ;;  %v657_v52 = vsel %vm1812_vm1, %v1428_v21, -inf }
 0x18f   :  { %v408_v9 = vmul.f32 2.0, %v226_v53  ;;  %v416_v35 = vmul.f32 2.0, %v266_v29  ;;  %v649_v28 = vsel %vm1811_vm10, %v1426_v6, -inf  ;;  %v694_v36 = vsel %vm1546_vm2, %v1428_v21, inf  ;;  %vm1580_vm6 = vmand %vm1380_vm11, %vm1813_vm4 }
 0x190   :  { %vm1816_vm15 = vcmp.eq.s32.totalorder %v1259_v45, %v1307_v7  ;;  %v689_v6 = vsel %vm1523_vm12, %v1529_v40, inf  ;;  %vm1817_vm2 = vcmp.eq.s32.totalorder %v1291_v61, %v1307_v7  ;;  %v697_v32 = vsel %vm1554_vm9, %v1532_v41, inf }
 0x191   :  { %v1589_v60 = vsel %vm1816_vm15, %v1529_v40, -inf  ;;  %v660_v55 = vsel %vm1817_vm2, %v1532_v41, -inf  ;;  %v847_v21 = vpop.f32.mrb[6].mxu0  ;;  %v859_v18 = vpop.f32.mrb[6].mxu1  ;;  %vm1818_vm11 = vcmp.eq.s32.totalorder %v1281_v56, 1  ;;  %v425_v38 = vsub.f32 %v1317_v13, %v409_v20 }
 0x192   :  { %vm1605_vm1 = vmand %vm1392_vm14, %vm1818_vm11  ;;  %v433_v61 = vsub.f32 %v1345_v23, %v417_v34  ;;  %v424_v63 = vsub.f32 %v1321_v14, %v408_v9  ;;  %v432_v19 = vsub.f32 %v1347_v24, %v416_v35  ;;  %v236_v59 = vpop.f32.mrb[7].mxu0  ;;  %v276_v40 = vpop.f32.mrb[7].mxu1  ;;  %vm1821_vm9 = vcmp.eq.s32.totalorder %v1303_v4, %v1307_v7 }
 0x193   :  { %vm550_vm14 = vmxor %vm1821_vm9, %vm1102_vm3  ;;  %vm1822_vm15 = vcmp.eq.s32.totalorder %v1261_v46, %v1307_v7  ;;  %v411_v13 = vmul.f32 2.0, %v847_v21  ;;  %v419_v23 = vmul.f32 2.0, %v859_v18  ;;  %v410_v14 = vmul.f32 2.0, %v236_v59  ;;  %v1848_v21 = vld [vmem:[#allocation22_spill] sm:$0xff] }
 0x194   :  { %v651_v56 = vsel %vm1822_vm15, %v1535_v10, -inf  ;;  %vm1823_vm2 = vcmp.eq.s32.totalorder %v1305_v5, %v1307_v7  ;;  %vm631_vm12 = vcmp.eq.s32.totalorder %v1560_v1, 1  ;;  %vm1824_vm9 = vcmp.eq.s32.totalorder %v1263_v47, %v1307_v7 }
 0x195   :  { %vm549_vm11 = vmxor %vm1823_vm2, %vm1102_vm3  ;;  %v654_v24 = vsel %vm1824_vm9, %v425_v38, -inf  ;;  %v691_v37 = vsel %vm1580_vm6, %v425_v38, inf  ;;  %vm1825_vm15 = vcmp.eq.s32.totalorder %v1303_v4, %v1307_v7  ;;  %v418_v41 = vmul.f32 2.0, %v276_v40 }
 0x196   :  { %v662_v46 = vsel %vm1825_vm15, %v433_v61, -inf  ;;  %vm1826_vm4 = vcmp.eq.s32.totalorder %v1359_v26, 1  ;;  %v666_v29 = vmax.f32 %v1497_v51, %v654_v24  ;;  %v703_v11 = vmin.f32 %v687_v12, %v691_v37 }
 0x197   :  { %vm1639_vm10 = vmand %vm550_vm14, %vm1826_vm4  ;;  %vm1829_vm2 = vcmp.eq.s32.totalorder %v1265_v48, %v1307_v7  ;;  %v690_v20 = vsel %vm1605_vm1, %v424_v63, inf  ;;  %vm1830_vm6 = vcmp.eq.s32.totalorder %v1410_v0, 1  ;;  %vm1833_vm14 = vcmp.eq.s32.totalorder %v1305_v5, %v1307_v7 }
 0x198   :  { %v653_v47 = vsel %vm1829_vm2, %v424_v63, -inf  ;;  %vm1651_vm9 = vmand %vm549_vm11, %vm1830_vm6  ;;  %v699_v26 = vsel %vm1639_vm10, %v433_v61, inf  ;;  %v702_v9 = vmin.f32 %v686_v2, %v690_v20  ;;  %v661_v51 = vsel %vm1833_vm14, %v432_v19, -inf }
 0x199   :  { %v665_v34 = vmax.f32 %v649_v28, %v653_v47  ;;  %vm1834_vm4 = vcmp.eq.s32.totalorder %v1277_v54, 1  ;;  %v670_v0 = vmax.f32 %v666_v29, %v1506_v30  ;;  %v1837_v12 = vsel %vm1470_vm5, %v1414_v42, inf }
 0x19a   :  { %vm1664_vm1 = vmand %vm1461_vm0, %vm1834_vm4  ;;  %v707_v35 = vmin.f32 %v703_v11, %v1837_v12  ;;  %v698_v22 = vsel %vm1651_vm9, %v432_v19, inf  ;;  %v427_v5 = vsub.f32 %v1323_v15, %v411_v13  ;;  %vm1838_vm10 = vcmp.eq.s32.totalorder %v1283_v57, 1 }
 0x19b   :  { %vm640_vm0 = vmand %vm1480_vm7, %vm1838_vm10  ;;  %v669_v54 = vmax.f32 %v665_v34, %v657_v52  ;;  %v706_v25 = vmin.f32 %v702_v9, %v694_v36  ;;  %v435_v28 = vsub.f32 %v1361_v27, %v419_v23  ;;  %v426_v30 = vsub.f32 %v1325_v16, %v410_v14  ;;  %v1846_v52 = vld [vmem:[#allocation21_spill] sm:$0xff] }
 0x19c   :  { %vm1839_vm11 = vcmp.eq.s32.totalorder %v1285_v58, 1  ;;  %v674_v15 = vmax.f32 %v670_v0, %v662_v46  ;;  %v711_v31 = vmin.f32 %v707_v35, %v699_v26  ;;  %vm1842_vm15 = vcmp.eq.s32.totalorder %v1267_v49, %v1307_v7  ;;  %v723_v26 = vld [vmem:[#allocation2] sm:$0x1] }
 0x19d   :  { %vm1686_vm5 = vmand %vm1515_vm13, %vm1839_vm11  ;;  %v656_v57 = vsel %vm1842_vm15, %v427_v5, -inf  ;;  %v693_v39 = vsel %vm640_vm0, %v427_v5, inf  ;;  %vm1843_vm7 = vcmp.eq.s32.totalorder %v1293_v62, %v1307_v7  ;;  %v673_v58 = vmax.f32 %v669_v54, %v661_v51 }
 0x19e   :  { %vm1697_vm2 = vmxor %vm1843_vm7, %vm1102_vm3  ;;  %v710_v27 = vmin.f32 %v706_v25, %v698_v22  ;;  %v668_v43 = vmax.f32 %v1589_v60, %v656_v57  ;;  %v705_v2 = vmin.f32 %v689_v6, %v693_v39  ;;  %v688_v49 = vsel %vm1664_vm1, %v1535_v10, inf }
 0x19f   :  { %vm552_vm13 = vmxor %vm520_vm8, %vm1102_vm3  ;;  %vm1847_vm6 = vcmp.eq.s32.totalorder %v1846_v52, %v1307_v7  ;;  %v692_v44 = vsel %vm1686_vm5, %v426_v30, inf  ;;  %v434_v18 = vsub.f32 %v1848_v21, %v418_v41  ;;  %vm1849_vm9 = vcmp.eq.s32.totalorder %v1474_v33, 1 }
 0x1a0   :  { %v655_v36 = vsel %vm1847_vm6, %v426_v30, -inf  ;;  %vm648_vm14 = vmand %vm552_vm13, %vm1849_vm9  ;;  %v677_v60 = vmax.f32 %v673_v58, %v674_v15  ;;  %v714_v6 = vmin.f32 %v710_v27, %v711_v31  ;;  %v672_v45 = vmax.f32 %v668_v43, %v660_v55 }
 0x1a1   :  { %v709_v38 = vmin.f32 %v705_v2, %v697_v32  ;;  %vm1850_vm4 = vcmp.eq.s32.totalorder %v1301_v3, 1  ;;  %v664_v10 = vsel %vm520_vm8, %v435_v28, -inf  ;;  %v701_v61 = vsel %vm648_vm14, %v435_v28, inf  ;;  %vm1852_vm11 = vmmov %vm1843_vm7 }
 0x1a2   :  { %vm643_vm1 = vmand %vm1697_vm2, %vm1850_vm4  ;;  %v667_v63 = vmax.f32 %v651_v56, %v655_v36  ;;  %v704_v19 = vmin.f32 %v688_v49, %v692_v44  ;;  %vm1851_vm10 = vcmp.eq.s32.totalorder %v1329_v17, %v1307_v7  ;;  %v659_v3 = vsel %vm1852_vm11, %v1538_v50, -inf  ;;  %v726_v7 = vld [vmem:[#allocation3] sm:$0x1] }
 0x1a3   :  { %vm551_vm0 = vmxor %vm1851_vm10, %vm1102_vm3  ;;  %v696_v33 = vsel %vm643_vm1, %v1538_v50, inf  ;;  %v676_v55 = vmax.f32 %v672_v45, %v664_v10  ;;  %v713_v32 = vmin.f32 %v709_v38, %v701_v61 }
 0x1a4   :  { %vm647_vm8 = vmand %vm551_vm0, %vm631_vm12  ;;  %v671_v8 = vmax.f32 %v667_v63, %v659_v3  ;;  %v708_v59 = vmin.f32 %v704_v19, %v696_v33 }
 0x1a5   :  { %vm1853_vm5 = vmmov %vm1851_vm10  ;;  %v700_v56 = vsel %vm647_vm8, %v434_v18, inf }
 0x1a6   :  { %v663_v40 = vsel %vm1853_vm5, %v434_v18, -inf  ;;  %v712_v23 = vmin.f32 %v708_v59, %v700_v56 }
 0x1a7   :  { %v675_v13 = vmax.f32 %v671_v8, %v663_v40 }
 0x1a8   :  { %v715_v24 = vmin.f32 %v712_v23, %v713_v32 }
 0x1a9   :  { %v678_v14 = vmax.f32 %v675_v13, %v676_v55 }
 0x1aa   :  { %v716_v37 = vmin.f32 %v714_v6, %v715_v24 }
 0x1ab   :  { %v679_v62 = vmax.f32 %v677_v60, %v678_v14 }
 0x1ac   :  { %v717_v50 = vrot.slane %v716_v37, 4 }
 0x1ad   :  { %v680_v46 = vrot.slane %v679_v62, 4 }
 0x1ae   :  { %v718_v53 = vmin.f32 %v716_v37, %v717_v50 }
 0x1af   :  { %v681_v41 = vmax.f32 %v679_v62, %v680_v46 }
 0x1b0   :  { %v719_v1 = vrot.slane %v718_v53, 2 }
 0x1b1   :  { %v682_v29 = vrot.slane %v681_v41, 2 }
 0x1b2   :  { %v720_v47 = vmin.f32 %v718_v53, %v719_v1 }
 0x1b3   :  { %v683_v11 = vmax.f32 %v681_v41, %v682_v29 }
 0x1b4   :  { %v721_v4 = vrot.slane %v720_v47, 1 }
 0x1b5   :  { %v684_v20 = vrot.slane %v683_v11, 1 }
 0x1b6   :  { %v722_v34 = vmin.f32 %v720_v47, %v721_v4 }
 0x1b7   :  { %v685_v17 = vmax.f32 %v683_v11, %v684_v20 }
 0x1b8   :  { %v727_v51 = vmin.f32 %v726_v7, %v722_v34 }
 0x1b9   :  { %v724_v9 = vmax.f32 %v723_v26, %v685_v17 }
 0x1ba   :  { %728 = vst [vmem:[#allocation3] sm:$0x1] %v727_v51 }
 0x1bb   :  { %725 = vst [vmem:[#allocation2] sm:$0x1] %v724_v9 }
 0x1c1   :  { %v742_v0 = vld [vmem:[#allocation3] sm:$0x1] }
 0x1c2   :  { %v732_v48 = vld [vmem:[#allocation2] sm:$0x1]  ;;  %v743_v35 = vmax.f32 %v742_v0, 1e-12 }
 0x1c3   :  { %v733_v12 = vmax.f32 %v732_v48, 1e-12 }
 0x1c4   :  { %vm746_vm15 = vcmp.eq.f32.partialorder %v743_v35, inf  ;;  %v749_v42 = vand.u32 2147483648, %v743_v35  ;;  %vm748_vm7 = vcmp.eq.f32.partialorder %v743_v35, 0.0 }
 0x1c5   :  { %923 = vrsqrt.f32 %v733_v12  ;;  %vm736_vm3 = vcmp.eq.f32.partialorder %v733_v12, inf  ;;  %v739_v25 = vand.u32 2147483648, %v733_v12  ;;  %vm738_vm12 = vcmp.eq.f32.partialorder %v733_v12, 0.0 }
 0x1c6   :  { %925 = vrsqrt.f32 %v743_v35 }
 0x1cf   :  { %v924_v22 = vpop.eup %923 }
 0x1d0   :  { %v926_v5 = vpop.eup %925  ;;  %v735_v54 = vmul.f32 %v924_v22, %v733_v12 }
 0x1d1   :  { %v745_v28 = vmul.f32 %v926_v5, %v743_v35 }
 0x1d2   :  { %v737_v30 = vsel %vm736_vm3, %v733_v12, %v735_v54 }
 0x1d3   :  { %v740_v15 = vsel %vm738_vm12, %v739_v25, %v737_v30  ;;  %v747_v31 = vsel %vm746_vm15, %v743_v35, %v745_v28 }
 0x1d4   :  { %741 = vst [vmem:[#allocation15] sm:$0x1] %v740_v15  ;;  %v750_v57 = vsel %vm748_vm7, %v749_v42, %v747_v31 }
 0x1d5   :  { %751 = vst [vmem:[#allocation15 + $0x1] sm:$0x1] %v750_v57 }
 0x1d6   :  { %1070 = shalt.err (!%p1067_p10)
}
 0x1d7   :  { %s1071_s22 = scalar_lea.hbm %s1756_s6, 32 }
 0x1d8   :  { %p1072_p11 = scmp.ne.s32.totalorder %s1756_s6, %s1071_s22  ;;  %p1075_p12 = scmp.lt.u32.totalorder %s1071_s22, %s1756_s6 }
 0x1da   :  { %p1077_p13 = pnand %p1075_p12, %p1072_p11 }
 0x1dc   :  { %1080 = shalt.err (!%p1077_p13)
}
 0x1dd   :  { %761 = dma.vmem_to_hbm [thread:$0]  %s759_s9, 32, %s1756_s6, [#allocation6]  }
 0x1de   :  { %1089 = dma.done.wait [#allocation6], 32  }
 0x1df   :  { %1090 = vsyncadd [#allocation6], 4294967264 }
 0x1e0   :  { %765 = vsyncpa [#allocation5], 1 }
 0x1e1   :  { %766 = vsyncpa [#allocation8], 1 }
 0x1e2   :  { %767 = vsyncpa [#allocation11], 1 }
 0x1e3   :  { %768 = vsyncpa [#allocation14], 1 }
 0x1e4   :  { %769 = vsyncpa [#allocation6], 1 }

</bundles_post_ra>
